<compile_context>
chip_gen: v6e
topology: v6e:2x2x1
jax: 0.10.0
libtpu: 0.0.40
codegen_flags: <defaults>
</compile_context>

<pallas_src>
import functools

import jax
import jax.numpy as jnp
import numpy as np
from jax.experimental import pallas as pl
from jax.experimental.pallas import tpu as pltpu

MAX_VALUE = 9          # default from get_max_value (no observation_space.max_value attr)
NUM_CHANNELS = 3       # fixed by offsets = [0, max_value, 2*max_value]
VOCAB = NUM_CHANNELS * MAX_VALUE  # 27


def _bow_embed_kernel(x_ref, embT_ref, out_ref, *, hw, tile, bb, ragged):
    """Per (batch-block, pixel-tile) grid step.

    x_ref:    (bb, 3, tile) raw observation values (cast to int32 here)
    embT_ref: (E, VOCAB)    transposed embedding table, VMEM-resident across steps
    out_ref:  (bb, E, tile) lane-dense output block (pixels on the lane axis)
    """
    embT = embT_ref[...]                                             # (E, VOCAB)
    iota = jax.lax.broadcasted_iota(jnp.int32, (VOCAB, tile), 0)     # vocab id per sublane row
    if ragged:
        lane = jax.lax.broadcasted_iota(jnp.int32, (1, tile), 1)
        valid = (pl.program_id(1) * tile + lane) < hw                # (1, tile)

    for i in range(bb):                                              # static unroll over the batch sub-block
        vals = x_ref[i].astype(jnp.int32)                            # (3, tile)
        onehot = None
        for c in range(NUM_CHANNELS):
            col = vals[c:c + 1, :] + c * MAX_VALUE                   # (1, tile), lanes = pixels
            if ragged:
                col = jnp.where(valid, col, -1)                      # -1 never matches iota
            hit = iota == col                                        # (VOCAB, tile) bool
            onehot = hit if onehot is None else (onehot | hit)       # disjoint vocab ranges: OR == sum
        # Embedding gather + channel sum fused into one MXU matmul.
        out_ref[i] = jnp.dot(
            embT, onehot.astype(embT.dtype), preferred_element_type=jnp.float32
        ).astype(out_ref.dtype)


def _align_down_128(x):
    return max(128, (x // 128) * 128)


def _align_up_128(x):
    return ((x + 127) // 128) * 128


def image_bow_embedding(inputs, emb_table, *, target_lanes=4096,
                        mm_dtype=jnp.bfloat16, out_dtype=jnp.float32,
                        vmem_budget_bytes=12 * 1024 * 1024):
    """inputs: (B, 3, H, W) float or int array (NCHW, like PyTorch).
    emb_table: (3*max_value, E) float32 (nn.Embedding weight).
    Returns: (B, E, H, W) out_dtype array, matching the PyTorch module output."""
    B, C, H, W = inputs.shape
    assert C == NUM_CHANNELS
    HW = H * W
    E = emb_table.shape[1]

    x = inputs.reshape(B, C, HW)                      # pure reshape: no HBM transpose pass
    embT = jnp.transpose(emb_table).astype(mm_dtype)  # (E, VOCAB); tiny (27*E elements)

    # ---- tile / batch-block selection under a VMEM budget safe on v5e (16 MiB scoped default),
    #      v6e (32 MiB) and v7x (32 MiB scoped / 64 MiB physical). -------------------------------
    in_b = jnp.dtype(inputs.dtype).itemsize
    out_b = jnp.dtype(out_dtype).itemsize
    mm_b = jnp.dtype(mm_dtype).itemsize
    # Per lane of the (bb*tile) pixel window: double-buffered input+output blocks plus ~2 live
    # (VOCAB, tile) one-hots (conservative).
    bytes_per_lane = 2 * (NUM_CHANNELS * in_b + E * out_b) + 2 * VOCAB * mm_b
    max_lanes = max(128, vmem_budget_bytes // bytes_per_lane)
    target = max(128, min(target_lanes, max_lanes))

    if HW >= target:
        tile = _align_down_128(target)                # big lane-aligned pixel tile
        bb = 1
    else:
        tile = HW                                     # full-extent lane block (always legal)
        bb = max(1, min(B, 32, target // max(HW, 1))) # fuse batch elements onto the grid step

    # v7x has 2 TensorCores per chip: make sure a tiny problem still yields >= 2 grid steps.
    if pl.cdiv(B, bb) * pl.cdiv(HW, tile) < 2:
        if B >= 2:
            bb = pl.cdiv(B, 2)
        elif HW >= 256:
            tile = _align_up_128(pl.cdiv(HW, 2))

    n_bblk = pl.cdiv(B, bb)
    n_tiles = pl.cdiv(HW, tile)
    ragged = (HW % tile) != 0

    kernel = functools.partial(_bow_embed_kernel, hw=HW, tile=tile, bb=bb, ragged=ragged)

    out = pl.pallas_call(
        kernel,
        out_shape=jax.ShapeDtypeStruct((B, E, HW), out_dtype),
        grid_spec=pltpu.PrefetchScalarGridSpec(
            num_scalar_prefetch=0,
            grid=(n_bblk, n_tiles),
            in_specs=[
                pl.BlockSpec((bb, C, tile), lambda b, p: (b, 0, p)),   # pixel tile of raw values
                pl.BlockSpec((E, VOCAB), lambda b, p: (0, 0)),         # table fetched once, resident
            ],
            out_specs=pl.BlockSpec((bb, E, tile), lambda b, p: (b, 0, p)),
        ),
        compiler_params=pltpu.CompilerParams(
            dimension_semantics=("parallel", "parallel"),
            vmem_limit_bytes=32 * 1024 * 1024,
        ),
    )(x, embT)

    # Free reshape to the PyTorch output layout (B, E, H, W).
    return out.reshape(B, E, H, W)


def _reference(inputs, emb_table):
    """Pure-JAX reference of the PyTorch forward."""
    offsets = jnp.array([0, MAX_VALUE, 2 * MAX_VALUE], dtype=inputs.dtype)
    idx = (inputs + offsets[None, :, None, None]).astype(jnp.int32)   # (B,3,H,W)
    out = jnp.take(emb_table, idx, axis=0).sum(1)                     # (B,H,W,E)
    return jnp.transpose(out, (0, 3, 1, 2))                           # (B,E,H,W)


if __name__ == "__main__":
    key = jax.random.PRNGKey(0)
    k_emb, k1, k2, k3 = jax.random.split(key, 4)

    E = 32
    # nn.Embedding default init: N(0, 1). (initialize_parameters only touches Linear layers.)
    emb_table = jax.random.normal(k_emb, (VOCAB, E), dtype=jnp.float32)

    # Case 1: B=2, 3x16x16 (HW=256). Default bf16-operand MXU path (one-hot exact, table rounds).
    x1 = jax.random.randint(k1, (2, NUM_CHANNELS, 16, 16), 0, MAX_VALUE).astype(jnp.float32)
    out1 = jax.block_until_ready(image_bow_embedding(x1, emb_table))
    assert out1.shape == (2, E, 16, 16)
    np.testing.assert_allclose(np.asarray(out1), np.asarray(_reference(x1, emb_table)),
                               rtol=2e-2, atol=2e-2)

    # Case 1b: same inputs, bit-accurate f32 matmul path.
    out1f = jax.block_until_ready(image_bow_embedding(x1, emb_table, mm_dtype=jnp.float32))
    np.testing.assert_allclose(np.asarray(out1f), np.asarray(_reference(x1, emb_table)),
                               rtol=1e-5, atol=1e-5)

    # Case 2: small RL-style observations (7x7): batch fusion (bb>1 per grid step) with a ragged
    # last batch block (B=5 -> bb=3, 2 grid steps).
    x2 = jax.random.randint(k2, (5, NUM_CHANNELS, 7, 7), 0, MAX_VALUE).astype(jnp.float32)
    out2 = jax.block_until_ready(image_bow_embedding(x2, emb_table))
    assert out2.shape == (5, E, 7, 7)
    np.testing.assert_allclose(np.asarray(out2), np.asarray(_reference(x2, emb_table)),
                               rtol=2e-2, atol=2e-2)

    # Case 3: large image (HW=5120) -> big 4096-lane tile with a ragged, index-masked last tile.
    x3 = jax.random.randint(k3, (1, NUM_CHANNELS, 64, 80), 0, MAX_VALUE).astype(jnp.float32)
    out3 = jax.block_until_ready(image_bow_embedding(x3, emb_table, target_lanes=4096))
    assert out3.shape == (1, E, 64, 80)
    np.testing.assert_allclose(np.asarray(out3), np.asarray(_reference(x3, emb_table)),
                               rtol=2e-2, atol=2e-2)

    print("KERNEL_OK")
</pallas_src>

<mosaic_0001>
module attributes {stable_mosaic.version = 11 : i64} {
  func.func @_bow_embed_kernel(%arg0: i32, %arg1: i32, %arg2: memref<1x3x256xf32, #tpu.memory_space<vmem>>, %arg3: memref<32x27xbf16, #tpu.memory_space<vmem>>, %arg4: memref<1x32x256xf32, #tpu.memory_space<vmem>>) attributes {dimension_semantics = [#tpu.dimension_semantics<parallel>, #tpu.dimension_semantics<parallel>], iteration_bounds = array<i64: 2, 1>, scalar_prefetch = 0 : i64, scratch_operands = 0 : i64, tpu.core_type = #tpu.core_type<tc>, window_params = [{transform_indices = @transform_0, window_bounds = array<i64: 1, 3, 256>}, {pipeline_mode = #tpu.pipeline_mode<synchronous>, transform_indices = @transform_1, window_bounds = array<i64: 32, 27>}, {transform_indices = @transform_2, window_bounds = array<i64: 1, 32, 256>}]} {
    %c0 = arith.constant 0 : index
    %c0_0 = arith.constant 0 : index
    %0 = vector.load %arg3[%c0, %c0_0] : memref<32x27xbf16, #tpu.memory_space<vmem>>, vector<32x27xbf16>
    %1 = tpu.iota {dimensions = array<i32: 0>} : vector<27x256xi32>
    %c0_1 = arith.constant 0 : index
    %c0_2 = arith.constant 0 : index
    %c0_3 = arith.constant 0 : index
    %2 = vector.load %arg2[%c0_1, %c0_2, %c0_3] : memref<1x3x256xf32, #tpu.memory_space<vmem>>, vector<1x3x256xf32>
    %3 = vector.shape_cast %2 : vector<1x3x256xf32> to vector<3x256xf32>
    %4 = arith.fptosi %3 : vector<3x256xf32> to vector<3x256xi32>
    %5 = vector.extract_strided_slice %4 {offsets = [0, 0], sizes = [1, 256], strides = [1, 1]} : vector<3x256xi32> to vector<1x256xi32>
    %c0_i32 = arith.constant 0 : i32
    %6 = vector.broadcast %c0_i32 : i32 to vector<1x256xi32>
    %7 = arith.addi %5, %6 : vector<1x256xi32>
    %8 = vector.broadcast %7 : vector<1x256xi32> to vector<27x256xi32>
    %9 = arith.cmpi eq, %1, %8 : vector<27x256xi32>
    %10 = vector.extract_strided_slice %4 {offsets = [1, 0], sizes = [1, 256], strides = [1, 1]} : vector<3x256xi32> to vector<1x256xi32>
    %c9_i32 = arith.constant 9 : i32
    %11 = vector.broadcast %c9_i32 : i32 to vector<1x256xi32>
    %12 = arith.addi %10, %11 : vector<1x256xi32>
    %13 = vector.broadcast %12 : vector<1x256xi32> to vector<27x256xi32>
    %14 = arith.cmpi eq, %1, %13 : vector<27x256xi32>
    %15 = arith.ori %9, %14 : vector<27x256xi1>
    %16 = vector.extract_strided_slice %4 {offsets = [2, 0], sizes = [1, 256], strides = [1, 1]} : vector<3x256xi32> to vector<1x256xi32>
    %c18_i32 = arith.constant 18 : i32
    %17 = vector.broadcast %c18_i32 : i32 to vector<1x256xi32>
    %18 = arith.addi %16, %17 : vector<1x256xi32>
    %19 = vector.broadcast %18 : vector<1x256xi32> to vector<27x256xi32>
    %20 = arith.cmpi eq, %1, %19 : vector<27x256xi32>
    %21 = arith.ori %15, %20 : vector<27x256xi1>
    %22 = arith.extui %21 : vector<27x256xi1> to vector<27x256xi32>
    %23 = arith.sitofp %22 : vector<27x256xi32> to vector<27x256xf32>
    %24 = arith.truncf %23 : vector<27x256xf32> to vector<27x256xbf16>
    %cst = arith.constant dense<0.000000e+00> : vector<32x256xf32>
    %25 = tpu.matmul %0, %24, %cst {dimension_numbers = #tpu.dot_dimension_numbers<[1], [0], [0], [1], [0, 0, 1, 1], [], []>} : vector<32x27xbf16>, vector<27x256xbf16>, vector<32x256xf32> -> vector<32x256xf32>
    %c0_4 = arith.constant 0 : index
    %c0_5 = arith.constant 0 : index
    %c0_6 = arith.constant 0 : index
    %26 = vector.load %arg4[%c0_4, %c0_5, %c0_6] : memref<1x32x256xf32, #tpu.memory_space<vmem>>, vector<1x32x256xf32>
    %27 = vector.shape_cast %26 : vector<1x32x256xf32> to vector<32x256xf32>
    %28 = vector.shape_cast %25 : vector<32x256xf32> to vector<1x32x256xf32>
    tpu.vector_store %arg4[%c0_4, %c0_5, %c0_6], %28 {strides = array<i32>} : memref<1x32x256xf32, #tpu.memory_space<vmem>>, vector<1x32x256xf32>,
    return
  }
  func.func @transform_0(%arg0: i32, %arg1: i32) -> (i32, i32, i32) {
    %c0_i32 = arith.constant 0 : i32
    %c0_i32_0 = arith.constant 0 : i32
    return %arg0, %c0_i32, %arg1 : i32, i32, i32
  }
  func.func @transform_1(%arg0: i32, %arg1: i32) -> (i32, i32) {
    %c0_i32 = arith.constant 0 : i32
    %c0_i32_0 = arith.constant 0 : i32
    %c0_i32_1 = arith.constant 0 : i32
    return %c0_i32, %c0_i32_0 : i32, i32
  }
  func.func @transform_2(%arg0: i32, %arg1: i32) -> (i32, i32, i32) {
    %c0_i32 = arith.constant 0 : i32
    %c0_i32_0 = arith.constant 0 : i32
    return %arg0, %c0_i32, %arg1 : i32, i32, i32
  }
}

</mosaic_0001>

<bundles_post_ra>
// kernel: tpu_custom_call.1
= control target key start
LH: loop header
LB: loop body
LE: loop exit
PB: predicated region body
PF: predicated region fallthrough
CT: control target
= control target key end

     0   :  { %7 = vsyncpa [#allocation3], 0  ;;  %s821_s0 = inlined_call_operand.vmem [shape: f32[2,3,256], index: 0, kind: input, shape index: {}]   ;;  %s822_s1 = inlined_call_operand.vmem [shape: bf16[32,27], index: 1, kind: input, shape index: {}]   ;;  %s823_s2 = inlined_call_operand.hbm [shape: f32[2,32,256], index: 2, kind: output, shape index: {}]  }
   0x1   :  { %9 = vsyncpa [#allocation3 + $0x1], 0  ;;  %s678_s9 = smov 0   ;;  %s680_s10 = smov 0  }
   0x2   :  { %s682_s11 = smov 0   ;;  %s684_s12 = smov 0  }
   0x3   :  { %s686_s13 = smov 0   ;;  %s688_s14 = smov 0  }
   0x4 LB: > { %s478_s15 = sadd.s32 4294967295, %s654_s14   ;;  %s479_s16 = sadd.s32 4294967294, %s654_s14   ;;  %s654_s14 = sphi %s688_s14, %s15_s14   ;;  %s650_s13 = sphi %s686_s13, %s832_s13   ;;  %s646_s12 = sphi %s684_s12, %s831_s12   ;;  %s642_s11 = sphi %s682_s11, %s830_s11   ;;  %s638_s10 = sphi %s680_s10, %s829_s10   ;;  %s634_s9 = sphi %s678_s9, %s828_s9  }
   0x5   : > { %s27_s17 = sadd.s32 1, %s650_s13  ;;  %s85_s18 = sadd.s32 1, %s642_s11 }
   0x6   : > { %p29_p0 = scmp.ge.s32.totalorder %s27_s17, 2  ;;  %p95_p1 = scmp.ne.s32.totalorder %s642_s11, %s638_s10 }
   0x7   : > { %p96_p2 = scmp.eq.s32.totalorder %s478_s15, 1  ;;  %p101_p3 = scmp.ne.s32.totalorder %s638_s10, %s634_s9 }
   0x8   : > { %s834_s17 = smov (%p29_p0, %s27_s17), 0  ;;  %p102_p5 = scmp.eq.s32.totalorder %s479_s16, 1 }
   0x9   : > { %p718_p4 = por %p96_p2, %p95_p1  ;;  %s80_s20 = ssub.s32 %s650_s13, %s834_s17 }
   0xa   : > { %p482_p6 = scmp.ge.s32.totalorder %s654_s14, 1  ;;  %p83_p7 = scmp.eq.s32.totalorder %s80_s20, 0 }
   0xb   : > { %p725_p8 = por %p102_p5, %p101_p3  ;;  %p136_p9 = scmp.lt.s32.totalorder %s654_s14, 3 }
   0xc   : > { %s731_s22 = scalar_select %p83_p7, %s642_s11, %s85_s18  }
   0xd   : > { %p137_p10 = pnand %p482_p6, %p136_p9 }
   0xe   : > { %p163_p11 = scmp.lt.s32.totalorder (!%p137_p10), %s646_s12, 1  ;;  %s159_s4 = sand.u32 (!%p137_p10), 1, %s638_s10  }
   0xf   : > { %140 = sbr.rel (%p137_p10) target bundleno = 270 (0x10e), region = 28  ;;  %s483_s5 = sshll.u32 (!%p137_p10), %s159_s4, 6 }
  0x10   : > { %s161_s6 = scalar_lea.vmem (!%p137_p10), [#allocation2], %s483_s5  ;;  %s508_s8 = sshll.u32 (!%p137_p10), %s646_s12, 10 }
  0x11   : > { %s399_s7 = sshll.u32 (!%p137_p10), %s161_s6, 4  ;;  %s774_s18 = scalar_lea.hbm (!%p137_p10), %s823_s2, %s508_s8  ;;  %s769_s7 = int_to_ptr.vmem [resolvable:$true] %s399_s7 }
  0x12   : > { %s578_s20 = scalar_lea.vmem (!%p137_p10), %s769_s7, 1024 }
  0x13   : > { %p579_p12 = scmp.ne.s32.totalorder (!%p137_p10), %s769_s7, %s578_s20 }
  0x14   : > { %v178_v0 = vlaneseq  ;;  %s164_s23 = scalar_select %p163_p11, %s646_s12, 1  ;;  %v656_v1 = vmov 0   ;;  %vm312_vm2 = vcmask 1044480   ;;  %vm313_vm9 = vcmask 1045504   ;;  %v576_v43 = vld [vmem:[%s822_s1] sm:$0xff]   ;;  %v577_v44 = vld [vmem:[%s822_s1 + $0x8] sm:$0xff]  }
  0x15   : > { %354 = vmatprep.mubr.bf16.mxu0 %v656_v1  ;;  %364 = vmatprep.mubr.bf16.mxu1 %v656_v1  ;;  %v657_v28 = vmov 65535   ;;  %v658_v31 = vmov 0.0   ;;  %v659_v42 = vmov 1.0|1.0   ;;  %s776_s12 = scalar_lea.sflag [#allocation3], %s159_s4  ;;  %p580_p13 = pnand %p579_p12, %p718_p4 }
  0x16   : > { %v735_v2 = vshrl.u32 %v178_v0, 7  ;;  %s507_s24 = sshll.u32 %s164_s23, 3  ;;  %v314_v29 = vsel %vm312_vm2, 4294967295, %v657_v28  ;;  %s660_s23 = smov [#allocation2]  }
  0x17   : > { %s170_s27 = scalar_lea.vmem %s821_s0, %s507_s24  ;;  %v315_v34 = vsel %vm313_vm9, %v314_v29, 0  ;;  %p581_p0 = pneg %p580_p13 }
  0x18   : > { %v183_v3 = vld [vmem:[%s170_s27] sm:$0x77]  ;;  %v187_v5 = vsub.s32 0, %v735_v2  ;;  %v191_v6 = vsub.s32 4, %v735_v2  ;;  %v216_v8 = vsub.s32 5, %v735_v2  ;;  %v249_v9 = vsub.s32 6, %v735_v2 }
  0x19   : > { %v513_v4 = vtrunc.f32 %v183_v3  ;;  %v181_v10 = vadd.s32 16, %v735_v2  ;;  %v212_v11 = vsub.s32 1, %v735_v2  ;;  %v245_v12 = vsub.s32 2, %v735_v2  ;;  %s582_s24 = sshll.u32 %s660_s23, 4  ;;  %s583_s24 = int_to_ptr.vmem [resolvable:$false] %s582_s24 }
  0x1a   : > { %v182_v17 = vadd.s32 24, %v735_v2  ;;  %v180_v30 = vadd.s32 8, %v735_v2  ;;  %s584_s25 = scalar_lea.vmem %s583_s24, 2048  ;;  %p585_p1 = scmp.lt.s32.totalorder %s769_s7, %s583_s24 }
  0x1b   : > { %v514_v7 = vcvt.f32.s32 %v513_v4  ;;  %p586_p2 = scmp.lt.s32.totalorder %s584_s25, %s578_s20 }
  0x1d   : > { %v192_v13 = vrot.slane %v514_v7, %v191_v6  ;;  %v209_v14 = vadd.s32 9, %v514_v7  ;;  %v242_v15 = vadd.s32 18, %v514_v7  ;;  %v188_v16 = vrot.slane %v514_v7, %v187_v5  ;;  %p587_p3 = por %p586_p2, %p585_p1 }
  0x1f   : > { %v200_v18 = vrot.slane %v192_v13, %v187_v5  ;;  %v217_v19 = vrot.slane %v209_v14, %v216_v8  ;;  %v250_v20 = vrot.slane %v242_v15, %v249_v9  ;;  %v213_v21 = vrot.slane %v209_v14, %v212_v11  ;;  %p588_p5 = pnand %p587_p3, %p581_p0 }
  0x20   : > { %v246_v22 = vrot.slane %v242_v15, %v245_v12  ;;  %v196_v25 = vrot.slane %v188_v16, %v187_v5 }
  0x21   : > { %vm206_vm0 = vcmp.eq.s32.totalorder %v181_v10, %v200_v18  ;;  %v225_v23 = vrot.slane %v217_v19, %v212_v11  ;;  %v258_v24 = vrot.slane %v250_v20, %v245_v12  ;;  %vm208_vm1 = vcmp.eq.s32.totalorder %v182_v17, %v200_v18 }
  0x22   : > { %v221_v26 = vrot.slane %v213_v21, %v212_v11  ;;  %v254_v27 = vrot.slane %v246_v22, %v245_v12  ;;  %vm205_vm10 = vcmp.eq.s32.totalorder %v181_v10, %v196_v25  ;;  %vm207_vm13 = vcmp.eq.s32.totalorder %v182_v17, %v196_v25 }
  0x23   : > { %vm231_vm3 = vcmp.eq.s32.totalorder %v181_v10, %v225_v23  ;;  %vm233_vm4 = vcmp.eq.s32.totalorder %v182_v17, %v225_v23  ;;  %vm264_vm5 = vcmp.eq.s32.totalorder %v181_v10, %v258_v24  ;;  %vm266_vm7 = vcmp.eq.s32.totalorder %v182_v17, %v258_v24 }
  0x24   : > { %vm239_vm6 = vmor %vm206_vm0, %vm231_vm3  ;;  %vm230_vm11 = vcmp.eq.s32.totalorder %v181_v10, %v221_v26  ;;  %vm232_vm14 = vcmp.eq.s32.totalorder %v182_v17, %v221_v26  ;;  %vm263_vm0 = vcmp.eq.s32.totalorder %v181_v10, %v254_v27  ;;  %vm202_vm2 = vcmp.eq.s32.totalorder %v735_v2, %v200_v18 }
  0x25   : > { %vm241_vm8 = vmor %vm208_vm1, %vm233_vm4  ;;  %vm265_vm1 = vcmp.eq.s32.totalorder %v182_v17, %v254_v27 }
  0x26   : > { %vm272_vm12 = vmor %vm239_vm6, %vm264_vm5  ;;  %vm227_vm5 = vcmp.eq.s32.totalorder %v735_v2, %v225_v23 }
  0x27   : > { %vm274_vm15 = vmor %vm241_vm8, %vm266_vm7  ;;  %v491_v32 = vsel %vm272_vm12, 1.0, %v658_v31  ;;  %vm204_vm7 = vcmp.eq.s32.totalorder %v180_v30, %v200_v18  ;;  %vm229_vm8 = vcmp.eq.s32.totalorder %v180_v30, %v225_v23 }
  0x28   : > { %v493_v33 = vsel %vm274_vm15, 1.0, %v658_v31  ;;  %vm238_vm3 = vmor %vm205_vm10, %vm230_vm11  ;;  %vm260_vm15 = vcmp.eq.s32.totalorder %v735_v2, %v258_v24  ;;  %vm262_vm10 = vcmp.eq.s32.totalorder %v180_v30, %v258_v24 }
  0x29   : > { %v294_v35 = vpack.c.bf16 %v493_v33, %v491_v32  ;;  %vm240_vm4 = vmor %vm207_vm13, %vm232_vm14  ;;  %vm201_vm14 = vcmp.eq.s32.totalorder %v735_v2, %v196_v25 }
  0x2a   : > { %vm271_vm6 = vmor %vm238_vm3, %vm263_vm0  ;;  %vm226_vm0 = vcmp.eq.s32.totalorder %v735_v2, %v221_v26 }
  0x2b   : > { %v320_v36 = vand.u32 %v315_v34, %v294_v35  ;;  %vm273_vm12 = vmor %vm240_vm4, %vm265_vm1  ;;  %v490_v37 = vsel %vm271_vm6, 1.0, %v658_v31  ;;  %vm203_vm1 = vcmp.eq.s32.totalorder %v180_v30, %v196_v25  ;;  %vm228_vm4 = vcmp.eq.s32.totalorder %v180_v30, %v221_v26 }
  0x2c   : > { %v492_v38 = vsel %vm273_vm12, 1.0, %v658_v31  ;;  %vm235_vm9 = vmor %vm202_vm2, %vm227_vm5  ;;  %vm259_vm5 = vcmp.eq.s32.totalorder %v735_v2, %v254_v27 }
  0x2d   : > { %334 = vmatprep.subr.bf16.mxu0 %v320_v36  ;;  %509 = vmatprep.subr.bf16.mxu1 %v320_v36  ;;  %v293_v39 = vpack.c.bf16 %v492_v38, %v490_v37  ;;  %vm237_vm11 = vmor %vm204_vm7, %vm229_vm8  ;;  %vm261_vm7 = vcmp.eq.s32.totalorder %v180_v30, %v254_v27 }
  0x2e   : > { %vm752_vm13 = vmor %vm235_vm9, %vm260_vm15 }
  0x2f   : > { %v317_v41 = vand.u32 %v315_v34, %v293_v39  ;;  %vm270_vm3 = vmor %vm237_vm11, %vm262_vm10  ;;  %vm305_vm10 = vcmask 220160  }
  0x30   : > { %vm496_vm2 = vmpackc.low %vm270_vm3, %vm752_vm13 }
  0x31   : > { %335 = vmatpush1.bf16.msra.mxu0 %v317_v41  ;;  %511 = vmatpush1.bf16.msra.mxu1 %v317_v41  ;;  %vm234_vm6 = vmor %vm201_vm14, %vm226_vm0 }
  0x32   : > { %497 = vmatprep.subr.msk.bf16.mxu0 %vm496_vm2, %v659_v42  ;;  %510 = vmatprep.subr.msk.bf16.mxu1 %vm496_vm2, %v659_v42  ;;  %vm236_vm8 = vmor %vm203_vm1, %vm228_vm4 }
  0x33   : > { %vm267_vm12 = vmor %vm234_vm6, %vm259_vm5 }
  0x34   : > { %vm269_vm15 = vmor %vm236_vm8, %vm261_vm7 }
  0x35   : > { %vm498_vm9 = vmpackc.low %vm269_vm15, %vm267_vm12 }
  0x36   : > { %499 = vmatpush1.bf16.msk.msra.mxu0 %vm498_vm9, %v659_v42  ;;  %512 = vmatpush1.bf16.msk.msra.mxu1 %vm498_vm9, %v659_v42 }
  0x39   : > { %500 = vmatmul.mubr.msk.bf16.vlgmr.msra.gmra.mxu0 %vm305_vm10, %v576_v43  ;;  %501 = vmatmul.mubr.msk.bf16.vlgmr.msra.gmra.mxu1 %vm305_vm10, %v577_v44 }
  0xf9   : > { %v356_v45 = vpop.f32.mrf.mxu0  ;;  %v366_v46 = vpop.f32.mrf.mxu1 }
  0xfa   : > { %375 = vst [vmem:[%s161_s6] sm:$0xff] %v356_v45  ;;  %379 = vst [vmem:[%s161_s6 + $0x20] sm:$0xff] %v366_v46 }
  0xfb   : > { %v358_v47 = vpop.f32.mrf.mxu0  ;;  %v368_v48 = vpop.f32.mrf.mxu1 }
  0xfc   : > { %376 = vst [vmem:[%s161_s6 + $0x8] sm:$0xff] %v358_v47  ;;  %380 = vst [vmem:[%s161_s6 + $0x28] sm:$0xff] %v368_v48 }
  0xfd   : > { %v360_v49 = vpop.f32.mrf.mxu0  ;;  %v370_v50 = vpop.f32.mrf.mxu1 }
  0xfe   : > { %377 = vst [vmem:[%s161_s6 + $0x10] sm:$0xff] %v360_v49  ;;  %381 = vst [vmem:[%s161_s6 + $0x30] sm:$0xff] %v370_v50 }
  0xff   : > { %v362_v51 = vpop.f32.mrf.mxu0  ;;  %v372_v52 = vpop.f32.mrf.mxu1 }
 0x100   : > { %378 = vst [vmem:[%s161_s6 + $0x18] sm:$0xff] %v362_v51  ;;  %382 = vst [vmem:[%s161_s6 + $0x38] sm:$0xff] %v372_v52 }
 0x101   : > { %591 = shalt.err (!%p588_p5)
}
 0x102   : > { %s592_s26 = scalar_lea.hbm %s774_s18, 1024  ;;  %s596_s29 = scalar_lea.hbm %s823_s2, 2048 }
 0x103   : > { %p593_p6 = scmp.ne.s32.totalorder %s774_s18, %s592_s26  ;;  %p597_p10 = scmp.lt.s32.totalorder %s774_s18, %s823_s2 }
 0x104   : > { %p598_p11 = scmp.lt.s32.totalorder %s596_s29, %s592_s26 }
 0x105   : > { %p594_p7 = pnand %p593_p6, %p718_p4 }
 0x106   : > { %p599_p12 = por %p598_p11, %p597_p10 }
 0x107   : > { %p595_p9 = pneg %p594_p7 }
 0x109   : > { %p600_p13 = pnand %p599_p12, %p595_p9 }
 0x10b   : > { %603 = shalt.err (!%p600_p13)
}
 0x10c   : > { %s661_s4 = smov 256   ;;  %s662_s5 = smov 16  }
 0x10d   : > { %515 = dma.vmem_to_hbm [thread:$0]  (%p718_p4), %s769_s7, 1024, %s774_s18, %s776_s12, %s661_s4, %s661_s4, %s662_s5  }
 0x10e PF: > { %p521_p0 = scmp.ge.s32.totalorder %s654_s14, 2  ;;  %s414_s6 = sand.u32 1, %s634_s9  }
 0x10f   : > { %s415_s8 = scalar_lea.sflag [#allocation3], %s414_s6 }
 0x110   : > { %p518_p1 = pnand %p521_p0, %p725_p8 }
 0x112   : > { %p519_p2 = pneg %p518_p1 }
 0x114   : > { %629 = dma.done.wait (%p519_p2), %s415_s8, 1024  }
 0x115   : > { %631 = vsyncadd (%p519_p2), %s415_s8, 4294966272  ;;  %s15_s14 = sadd.s32 1, %s654_s14   ;;  %s828_s9 = smov %s638_s10 }
 0x116   : > { %p12_p3 = scmp.ge.s32.totalorder %s15_s14, 4   ;;  %s829_s10 = smov %s642_s11 }
 0x117   : > { %s830_s11 = smov %s731_s22  ;;  %s831_s12 = smov %s650_s13 }
 0x118   : > { %s832_s13 = smov %s834_s17  ;;  %14 = sbr.rel (!%p12_p3) target bundleno = 4 (0x4), region = 63 }
 0x11d   :  { %420 = vsyncpa [#allocation3], 1 }
 0x11e   :  { %422 = vsyncpa [#allocation3 + $0x1], 1 }

</bundles_post_ra>
